<compile_context>
chip_gen: v7x
topology: tpu7x:2x2x1
jax: 0.10.0
libtpu: 0.0.40
codegen_flags: <defaults>
</compile_context>

<pallas_src>
import functools

import jax
import jax.numpy as jnp
from jax.experimental import pallas as pl
from jax.experimental.pallas import tpu as pltpu


_LANE = 128          # vreg lane width; minor dims are padded to 128 in VMEM
_NEG_BIG = -1e30     # finite "minus infinity" so online-softmax never sees inf-inf


def _round_up(x, m):
    return ((x + m - 1) // m) * m


def _sublane_pack(dtype):
    # Native sublane packing: 8 rows for 4-byte, 16 for 2-byte, 32 for 1-byte dtypes.
    return max(8, 32 // jnp.dtype(dtype).itemsize)


def _vmem_budgets():
    """Returns (tiling budget for blocks + temps, scoped vmem limit), generation aware."""
    try:
        cap = int(pltpu.get_tpu_info().vmem_capacity_bytes)
    except Exception:  # be conservative (v7x-sized) if the query is unavailable
        cap = 64 * 1024 * 1024
    if cap >= 100 * 1024 * 1024:        # v5e / v6e: 128 MiB physical VMEM
        return 72 * 1024 * 1024, 96 * 1024 * 1024
    return 36 * 1024 * 1024, 48 * 1024 * 1024   # v7x: 64 MiB per TensorCore


def _plan_tiles(n, c, dtype, budget, max_rows=None, max_cols=None):
    """Pick (tile_n, tile_c, num_c_tiles, num_splits, tiles_per_split, multi_c)."""
    itemsize = jnp.dtype(dtype).itemsize
    pack = _sublane_pack(dtype)

    def rows_for(tile_c, with_row_state):
        pad_c = _round_up(tile_c, _LANE)
        per_row = (2 * pad_c * itemsize      # double-buffered logits block (lane padded)
                   + 3 * pad_c * 4           # in-kernel f32 cast + exp / select temporaries
                   + 2 * _LANE * 4)          # (tile_n,1) i32 labels, lane padded, 2 buffers
        if with_row_state:
            per_row += 3 * _LANE * 4         # m / l / picked online-softmax row state
        rows = int(budget // per_row)
        return max(pack, (rows // pack) * pack)

    cols_cap = c if max_cols is None else max(1, min(c, int(max_cols)))
    single_pass = (cols_cap >= c) and (rows_for(c, False) >= max(64, pack))
    if single_pass:
        tile_c = c
        rows = rows_for(c, False)
    else:
        # C-tiled online-logsumexp path (vocabulary-scale C, or forced for testing).
        tile_c = min(_round_up(cols_cap, _LANE), 4096)
        while tile_c > _LANE and rows_for(tile_c, True) < 256:
            tile_c = _round_up(tile_c // 2, _LANE)
        rows = rows_for(tile_c, True)

    # Keep the DMA pipeline reasonably deep (>= ~8 steps) as long as each logits
    # block still streams >= ~0.5 MiB.
    row_bytes = max(1, tile_c * itemsize)
    rows_half_mib = _round_up(max(1, (512 * 1024) // row_bytes), pack)
    depth_cap = max(rows_half_mib, _round_up(pl.cdiv(n, 8), pack))

    tile_n = max(8, min(rows, depth_cap, _round_up(n, 8)))
    if max_rows is not None:
        tile_n = max(8, min(tile_n, _round_up(int(max_rows), 8)))

    num_c_tiles = pl.cdiv(c, tile_c)
    total_row_tiles = pl.cdiv(n, tile_n)
    num_splits = 2 if total_row_tiles >= 2 else 1   # feeds both TensorCores on v7x
    tiles_per_split = pl.cdiv(total_row_tiles, num_splits)
    return tile_n, tile_c, num_c_tiles, num_splits, tiles_per_split, (not single_pass)


def _ce_kernel(labels_ref, logits_ref, out_ref, *row_state, n_total, c_total,
               tile_n, tile_c, tiles_per_split, multi_c, need_col_mask):
    p = pl.program_id(0)          # row split (one per TensorCore on v7x)
    r = pl.program_id(1)          # row tile within the split
    k = pl.program_id(2)          # class tile (extent 1 on the single-pass path)

    @pl.when((r == 0) & (k == 0))
    def _zero_split_acc():
        out_ref[...] = jnp.zeros_like(out_ref)

    x = logits_ref[...].astype(jnp.float32)            # (tile_n, tile_c), cast in-kernel
    labels = labels_ref[...]                           # (tile_n, 1) int32
    tn, tc = x.shape
    col = jax.lax.broadcasted_iota(jnp.int32, (tn, tc), 1)

    def row_valid():
        # Mask rows past N (partial / duplicated edge tiles) and ignored /
        # out-of-range labels (PyTorch default ignore_index=-100 contributes 0).
        # NOTE: masking is a select, so NaN/Inf coming from padded edge rows is
        # discarded and never propagates into the accumulated sum.
        base = (p * tiles_per_split + r) * tile_n
        rows = jax.lax.broadcasted_iota(jnp.int32, (tn, 1), 0) + base
        return (rows < n_total) & (labels >= 0) & (labels < c_total)

    if not multi_c:
        # ---- single pass over the class dimension (tile_c == C) --------------
        row_max = jnp.max(x, axis=-1, keepdims=True)                      # (tn, 1)
        lse = jnp.log(jnp.sum(jnp.exp(x - row_max), axis=-1,
                              keepdims=True)) + row_max                   # (tn, 1)
        # Fused gather pred[i, label[i]] via compare+select (no one-hot temp).
        picked = jnp.sum(jnp.where(col == labels, x, 0.0),
                         axis=-1, keepdims=True)                          # (tn, 1)
        per_sample = jnp.where(row_valid(), lse - picked, 0.0)
        out_ref[...] = out_ref[...] + jnp.sum(per_sample)
    else:
        # ---- online logsumexp across C tiles (vocabulary-scale C) ------------
        m_ref, l_ref, pk_ref = row_state

        @pl.when(k == 0)
        def _init_row_state():
            m_ref[...] = jnp.full_like(m_ref, _NEG_BIG)
            l_ref[...] = jnp.zeros_like(l_ref)
            pk_ref[...] = jnp.zeros_like(pk_ref)

        col_g = col + k * tile_c
        x_m = jnp.where(col_g < c_total, x, _NEG_BIG) if need_col_mask else x

        m_prev = m_ref[...]
        m_new = jnp.maximum(m_prev, jnp.max(x_m, axis=-1, keepdims=True))
        l_ref[...] = (l_ref[...] * jnp.exp(m_prev - m_new)
                      + jnp.sum(jnp.exp(x_m - m_new), axis=-1, keepdims=True))
        m_ref[...] = m_new
        pk_ref[...] = pk_ref[...] + jnp.sum(
            jnp.where(col_g == labels, x, 0.0), axis=-1, keepdims=True)

        @pl.when(k == pl.num_programs(2) - 1)
        def _finish_row_tile():
            per_sample = m_ref[...] + jnp.log(l_ref[...]) - pk_ref[...]
            per_sample = jnp.where(row_valid(), per_sample, 0.0)
            out_ref[...] = out_ref[...] + jnp.sum(per_sample)


def flops_cross_entropy_loss(loss_flops, cls_score, label, *, loss_weight=1.0,
                             max_rows_per_tile=None, max_cols_per_tile=None):
    """Pallas-backed equivalent of FlopsCrossEntropyLoss().forward(loss_flops, cls_score, label).

    Args:
      loss_flops: scalar auxiliary flops loss (added to the CE loss).
      cls_score:  (N, C) float logits (any float dtype; streamed natively).
      label:      (N,) int class indices (-100 / out-of-range rows contribute 0).
      loss_weight: module's loss_weight.
      max_rows_per_tile / max_cols_per_tile: optional overrides (testing / tuning).
    Returns:
      scalar f32 loss.
    """
    # TODO(synk): sample-wise `weight`, `avg_factor`, `class_weight` and
    # reduction_override in {'none','sum'} are not wired up (module defaults only).
    n, c = cls_score.shape
    budget, vmem_limit = _vmem_budgets()
    (tile_n, tile_c, num_c_tiles, num_splits,
     tiles_per_split, multi_c) = _plan_tiles(
        n, c, cls_score.dtype, budget, max_rows_per_tile, max_cols_per_tile)

    last_row_block = pl.cdiv(n, tile_n) - 1

    def row_block(p, r):
        # Clamp so padded (split, tile) combinations re-read a real block; their
        # rows are fully masked out by the in-kernel row-validity check.
        return jnp.minimum(p * tiles_per_split + r, last_row_block)

    kernel = functools.partial(
        _ce_kernel, n_total=n, c_total=c, tile_n=tile_n, tile_c=tile_c,
        tiles_per_split=tiles_per_split, multi_c=multi_c,
        need_col_mask=(c % tile_c) != 0)

    scratch_shapes = []
    if multi_c:
        scratch_shapes = [pltpu.VMEM((tile_n, 1), jnp.float32) for _ in range(3)]

    itemsize = jnp.dtype(cls_score.dtype).itemsize
    cost = pl.CostEstimate(
        flops=6 * n * c,
        transcendentals=n * c + n,
        bytes_accessed=n * c * itemsize + n * 4 + num_splits * 4)

    # TODO(synk): if profiling shows the EUP exp slot binding for bf16 inputs on
    # v6e/v7x, switch the exp to bf16 (f32 accumulation); likewise
    # pipeline_mode=pl.Buffered(3) on the logits spec is an option for the
    # large-C path on v5e where VMEM headroom is plentiful.
    partial_sums = pl.pallas_call(
        kernel,
        out_shape=jax.ShapeDtypeStruct((num_splits, 1, 1), jnp.float32),
        grid=(num_splits, tiles_per_split, num_c_tiles),
        in_specs=[
            pl.BlockSpec((tile_n, 1), lambda p, r, k: (row_block(p, r), 0)),     # labels
            pl.BlockSpec((tile_n, tile_c), lambda p, r, k: (row_block(p, r), k)),  # logits
        ],
        out_specs=pl.BlockSpec((1, 1, 1), lambda p, r, k: (p, 0, 0)),  # per-split partial
        scratch_shapes=scratch_shapes,
        compiler_params=pltpu.CompilerParams(
            dimension_semantics=("parallel", "arbitrary", "arbitrary"),
            vmem_limit_bytes=vmem_limit),
        cost_estimate=cost,
    )(label.reshape(n, 1).astype(jnp.int32), cls_score)

    # Finalize (mean over N incl. ignored rows, loss_weight, + loss_flops) is one
    # tiny XLA op in the wrapper so each TensorCore only produces a partial sum.
    ce_mean = jnp.sum(partial_sums) / jnp.float32(n)
    return loss_weight * ce_mean + jnp.asarray(loss_flops, jnp.float32)


def _reference(loss_flops, cls_score, label, loss_weight=1.0):
    """Pure-JAX reference matching F.cross_entropy(..., reduction='none').mean()."""
    x = cls_score.astype(jnp.float32)
    logp = jax.nn.log_softmax(x, axis=-1)
    lbl = label.astype(jnp.int32)
    valid = (lbl >= 0) & (lbl < x.shape[-1])
    nll = -jnp.take_along_axis(logp, jnp.where(valid, lbl, 0)[:, None], axis=-1)[:, 0]
    nll = jnp.where(valid, nll, 0.0)
    return loss_weight * jnp.mean(nll) + jnp.asarray(loss_flops, jnp.float32)


if __name__ == "__main__":
    key = jax.random.PRNGKey(0)
    k1, k2, k3, k4 = jax.random.split(key, 4)

    # 1) module-sized case: N=8 samples, C=32 classes, f32 logits.
    N, C = 8, 32
    cls_score = jax.random.normal(k1, (N, C), dtype=jnp.float32)
    label = jax.random.randint(k2, (N,), 0, C, dtype=jnp.int32)
    loss_flops = jnp.float32(0.5)
    out = jax.block_until_ready(
        flops_cross_entropy_loss(loss_flops, cls_score, label, loss_weight=1.0))
    ref = _reference(loss_flops, cls_score, label, loss_weight=1.0)
    assert jnp.allclose(out, ref, rtol=1e-5, atol=1e-5), (out, ref)

    # 2) native-bf16 logits path (streamed without a host-side f32 upcast).
    cls_bf16 = cls_score.astype(jnp.bfloat16)
    out_bf16 = jax.block_until_ready(
        flops_cross_entropy_loss(loss_flops, cls_bf16, label, loss_weight=1.0))
    ref_bf16 = _reference(loss_flops, cls_bf16, label, loss_weight=1.0)
    assert jnp.allclose(out_bf16, ref_bf16, rtol=1e-5, atol=1e-5), (out_bf16, ref_bf16)

    # 3) exercise the dual-split / multi-row-tile / C-tiled online-logsumexp path
    #    (partial edge tiles, padded class tile, an ignored -100 label).
    N3, C3 = 70, 200
    x3 = jax.random.normal(k3, (N3, C3), dtype=jnp.float32)
    y3 = jax.random.randint(k4, (N3,), 0, C3, dtype=jnp.int32)
    y3 = y3.at[3].set(-100)
    out3 = jax.block_until_ready(
        flops_cross_entropy_loss(jnp.float32(0.25), x3, y3, loss_weight=2.0,
                                 max_rows_per_tile=32, max_cols_per_tile=128))
    ref3 = _reference(jnp.float32(0.25), x3, y3, loss_weight=2.0)
    assert jnp.allclose(out3, ref3, rtol=1e-4, atol=1e-4), (out3, ref3)

    print("KERNEL_OK")
</pallas_src>

<mosaic_0001>
module attributes {stable_mosaic.version = 11 : i64} {
  func.func @_ce_kernel(%arg0: i32, %arg1: i32, %arg2: i32, %arg3: memref<8x1xi32, #tpu.memory_space<vmem>>, %arg4: memref<8x32xf32, #tpu.memory_space<vmem>>, %arg5: memref<1x1x1xf32, #tpu.memory_space<vmem>>) attributes {dimension_semantics = [#tpu.dimension_semantics<parallel>, #tpu.dimension_semantics<arbitrary>, #tpu.dimension_semantics<arbitrary>], iteration_bounds = array<i64: 1, 1, 1>, scalar_prefetch = 0 : i64, scratch_operands = 0 : i64, tpu.core_type = #tpu.core_type<tc>, window_params = [{transform_indices = @transform_0, window_bounds = array<i64: 8, 1>}, {transform_indices = @transform_1, window_bounds = array<i64: 8, 32>}, {transform_indices = @transform_2, window_bounds = array<i64: 1, 1, 1>}]} {
    %c0_i32 = arith.constant 0 : i32
    %0 = arith.cmpi eq, %arg1, %c0_i32 : i32
    %c0_i32_0 = arith.constant 0 : i32
    %1 = arith.cmpi eq, %arg2, %c0_i32_0 : i32
    %2 = arith.andi %0, %1 : i1
    %3 = arith.extui %2 : i1 to i32
    %c0_i32_1 = arith.constant 0 : i32
    %4 = arith.cmpi ne, %3, %c0_i32_1 : i32
    scf.if %4 {
      %cst_18 = arith.constant 0.000000e+00 : f32
      %48 = vector.broadcast %cst_18 : f32 to vector<1x1x1xf32>
      %c0_19 = arith.constant 0 : index
      %c0_20 = arith.constant 0 : index
      %c0_21 = arith.constant 0 : index
      %49 = vector.load %arg5[%c0_19, %c0_20, %c0_21] : memref<1x1x1xf32, #tpu.memory_space<vmem>>, vector<1x1x1xf32>
      tpu.vector_store %arg5[%c0_19, %c0_20, %c0_21], %48 {strides = array<i32>} : memref<1x1x1xf32, #tpu.memory_space<vmem>>, vector<1x1x1xf32>,
    } else {
    }
    %c0 = arith.constant 0 : index
    %c0_2 = arith.constant 0 : index
    %5 = vector.load %arg4[%c0, %c0_2] : memref<8x32xf32, #tpu.memory_space<vmem>>, vector<8x32xf32>
    %c0_3 = arith.constant 0 : index
    %c0_4 = arith.constant 0 : index
    %6 = vector.load %arg3[%c0_3, %c0_4] : memref<8x1xi32, #tpu.memory_space<vmem>>, vector<8x1xi32>
    %7 = tpu.iota {dimensions = array<i32: 1>} : vector<8x32xi32>
    %cst = arith.constant dense<0xFF800000> : vector<8xf32>
    %8 = vector.multi_reduction <maximumf>, %5, %cst [1] : vector<8x32xf32> to vector<8xf32>
    %9 = vector.shape_cast %8 : vector<8xf32> to vector<8x1xf32>
    %10 = vector.broadcast %9 : vector<8x1xf32> to vector<8x32xf32>
    %11 = arith.subf %5, %10 : vector<8x32xf32>
    %12 = math.exp %11 : vector<8x32xf32>
    %cst_5 = arith.constant dense<0.000000e+00> : vector<8xf32>
    %13 = vector.multi_reduction <add>, %12, %cst_5 [1] : vector<8x32xf32> to vector<8xf32>
    %14 = vector.shape_cast %13 : vector<8xf32> to vector<8x1xf32>
    %15 = math.log %14 : vector<8x1xf32>
    %16 = arith.addf %15, %9 : vector<8x1xf32>
    %17 = vector.broadcast %6 : vector<8x1xi32> to vector<8x32xi32>
    %18 = arith.cmpi eq, %7, %17 : vector<8x32xi32>
    %cst_6 = arith.constant 0.000000e+00 : f32
    %19 = vector.broadcast %cst_6 : f32 to vector<8x32xf32>
    %20 = arith.select %18, %5, %19 : vector<8x32xi1>, vector<8x32xf32>
    %cst_7 = arith.constant dense<0.000000e+00> : vector<8xf32>
    %21 = vector.multi_reduction <add>, %20, %cst_7 [1] : vector<8x32xf32> to vector<8xf32>
    %22 = vector.shape_cast %21 : vector<8xf32> to vector<8x1xf32>
    %c1_i32 = arith.constant 1 : i32
    %23 = arith.muli %arg0, %c1_i32 : i32
    %24 = arith.addi %23, %arg1 : i32
    %c8_i32 = arith.constant 8 : i32
    %25 = arith.muli %24, %c8_i32 : i32
    %26 = tpu.iota {dimensions = array<i32: 0>} : vector<8x1xi32>
    %27 = vector.broadcast %25 : i32 to vector<8x1xi32>
    %28 = arith.addi %26, %27 : vector<8x1xi32>
    %c8_i32_8 = arith.constant 8 : i32
    %29 = vector.broadcast %c8_i32_8 : i32 to vector<8x1xi32>
    %30 = arith.cmpi slt, %28, %29 : vector<8x1xi32>
    %c0_i32_9 = arith.constant 0 : i32
    %31 = vector.broadcast %c0_i32_9 : i32 to vector<8x1xi32>
    %32 = arith.cmpi sge, %6, %31 : vector<8x1xi32>
    %33 = arith.andi %30, %32 : vector<8x1xi1>
    %c32_i32 = arith.constant 32 : i32
    %34 = vector.broadcast %c32_i32 : i32 to vector<8x1xi32>
    %35 = arith.cmpi slt, %6, %34 : vector<8x1xi32>
    %36 = arith.andi %33, %35 : vector<8x1xi1>
    %37 = arith.subf %16, %22 : vector<8x1xf32>
    %cst_10 = arith.constant 0.000000e+00 : f32
    %38 = vector.broadcast %cst_10 : f32 to vector<8x1xf32>
    %39 = arith.select %36, %37, %38 : vector<8x1xi1>, vector<8x1xf32>
    %c0_11 = arith.constant 0 : index
    %c0_12 = arith.constant 0 : index
    %c0_13 = arith.constant 0 : index
    %40 = vector.load %arg5[%c0_11, %c0_12, %c0_13] : memref<1x1x1xf32, #tpu.memory_space<vmem>>, vector<1x1x1xf32>
    %41 = vector.shape_cast %39 : vector<8x1xf32> to vector<1x8x1xf32>
    %cst_14 = arith.constant dense<0.000000e+00> : vector<1xf32>
    %42 = vector.multi_reduction <add>, %41, %cst_14 [1, 2] : vector<1x8x1xf32> to vector<1xf32>
    %43 = vector.shape_cast %42 : vector<1xf32> to vector<1x1x1xf32>
    %44 = vector.extract %43[0, 0, 0] : f32 from vector<1x1x1xf32>
    %45 = vector.broadcast %44 : f32 to vector<1x1x1xf32>
    %46 = arith.addf %40, %45 : vector<1x1x1xf32>
    %c0_15 = arith.constant 0 : index
    %c0_16 = arith.constant 0 : index
    %c0_17 = arith.constant 0 : index
    %47 = vector.load %arg5[%c0_15, %c0_16, %c0_17] : memref<1x1x1xf32, #tpu.memory_space<vmem>>, vector<1x1x1xf32>
    tpu.vector_store %arg5[%c0_15, %c0_16, %c0_17], %46 {strides = array<i32>} : memref<1x1x1xf32, #tpu.memory_space<vmem>>, vector<1x1x1xf32>,
    return
  }
  func.func @transform_0(%arg0: i32, %arg1: i32, %arg2: i32) -> (i32, i32) {
    %c1_i32 = arith.constant 1 : i32
    %0 = arith.muli %arg0, %c1_i32 : i32
    %1 = arith.addi %0, %arg1 : i32
    %c0_i32 = arith.constant 0 : i32
    %2 = arith.minsi %1, %c0_i32 : i32
    %c0_i32_0 = arith.constant 0 : i32
    %c0_i32_1 = arith.constant 0 : i32
    return %2, %c0_i32_0 : i32, i32
  }
  func.func @transform_1(%arg0: i32, %arg1: i32, %arg2: i32) -> (i32, i32) {
    %c1_i32 = arith.constant 1 : i32
    %0 = arith.muli %arg0, %c1_i32 : i32
    %1 = arith.addi %0, %arg1 : i32
    %c0_i32 = arith.constant 0 : i32
    %2 = arith.minsi %1, %c0_i32 : i32
    %c0_i32_0 = arith.constant 0 : i32
    return %2, %arg2 : i32, i32
  }
  func.func @transform_2(%arg0: i32, %arg1: i32, %arg2: i32) -> (i32, i32, i32) {
    %c0_i32 = arith.constant 0 : i32
    %c0_i32_0 = arith.constant 0 : i32
    %c0_i32_1 = arith.constant 0 : i32
    return %arg0, %c0_i32, %c0_i32_0 : i32, i32, i32
  }
}

</mosaic_0001>

<bundles_post_ra>
// kernel: tpu_custom_call.1
= control target key start
LH: loop header
LB: loop body
LE: loop exit
PB: predicated region body
PF: predicated region fallthrough
CT: control target
= control target key end

     0   :  { %vm78_vm0 = vcmask 261120   ;;  %s229_s0 = inlined_call_operand.vmem [shape: s32[8,1], index: 0, kind: input, shape index: {}]   ;;  %s230_s1 = inlined_call_operand.vmem [shape: f32[8,32], index: 1, kind: input, shape index: {}]   ;;  %s231_s2 = inlined_call_operand.hbm [shape: f32[1,1,1], index: 2, kind: output, shape index: {}]  }
   0x1   :  { %v74_v0 = vld [vmem:[%s230_s1] sm:$0xff] }
   0x2   :  { %7 = vsyncpa [#allocation3], 0  ;;  %v79_v1 = vsel %vm78_vm0, %v74_v0, -inf  ;;  %v188_v2 = vmov 0   ;;  %v75_v3 = vld [vmem:[%s229_s0] sm:$0xff]  ;;  %v76_v7 = vlaneseq  ;;  %vm113_vm5 = vcmask 7168  }
   0x3   :  { %159 = vset.pattern.permute.xlu0 %v188_v2  ;;  %vm106_vm2 = vcmp.ge.s32.totalorder %v75_v3, 0  ;;  %vm108_vm3 = vcmp.lt.s32.totalorder %v75_v3, 32  ;;  %vm72_vm6 = vcmask 0   ;;  %v189_v22 = vmov 0.0   ;;  %s190_s0 = smov [#allocation2]  }
   0x4   :  { %80 = vmax.xlane.f32.xlu0 %v79_v1  ;;  %v77_v8 = vand.u32 127, %v76_v7  ;;  %vm109_vm4 = vmand %vm106_vm2, %vm108_vm3  ;;  %73 = vst.msk [vmem:[#allocation2] sm:$0x1] %vm72_vm6, %v189_v22  ;;  %s134_s1 = sshll.u32 %s190_s0, 4  ;;  %s135_s1 = int_to_ptr.vmem [resolvable:$true] %s134_s1 }
   0x5   :  { %s164_s14 = scalar_lea.vmem %s135_s1, 16  ;;  %s168_s15 = scalar_lea.vmem %s135_s1, 32 }
   0x6   :  { %p165_p0 = scmp.ne.s32.totalorder %s135_s1, %s164_s14  ;;  %p169_p1 = scmp.lt.s32.totalorder %s135_s1, %s135_s1 }
   0x7   :  { %p170_p2 = scmp.lt.s32.totalorder %s168_s15, %s164_s14 }
   0x9   :  { %p171_p3 = por %p170_p2, %p169_p1 }
   0xb   :  { %v112_v30 = vld [vmem:[#allocation2] sm:$0x1]  ;;  %p172_p4 = pnand %p171_p3, %p165_p0 }
  0x1a   :  { %92 = vperm.xlu0 %159, %v75_v3  }
  0x91   :  { %v81_v4 = vpop.xlane.xlu0 %80 }
  0x92   :  { %v82_v5 = vsub.f32 %v74_v0, %v81_v4 }
  0x94   :  { %v83_v6 = vmul.f32 1.442695, %v82_v5 }
  0x96   :  { %160 = vpow2.f32 %v83_v6 }
  0x99   :  { %v93_v9 = vpop.permute.xlu0 %92 }
  0x9a   :  { %vm94_vm1 = vcmp.eq.s32.totalorder %v77_v8, %v93_v9 }
  0x9b   :  { %v95_v11 = vsel %vm94_vm1, %v74_v0, 0.0 }
  0x9c   :  { %v96_v13 = vsel %vm78_vm0, %v95_v11, 0.0 }
  0xa0   :  { %v161_v10 = vpop.eup %160 }
  0xa1   :  { %v85_v12 = vsel %vm78_vm0, %v161_v10, 0.0 }
  0xa2   :  { %86 = vadd.xlane.f32.xlu1 %v85_v12 }
  0xa6   :  { %97 = vadd.xlane.f32.xlu1 %v96_v13 }
 0x12f   :  { %v87_v14 = vpop.xlane.xlu1 %86 }
 0x130   :  { %162 = vlog2.f32 %v87_v14 }
 0x133   :  { %v98_v17 = vpop.xlane.xlu1 %97 }
 0x13a   :  { %v163_v15 = vpop.eup %162 }
 0x13b   :  { %v89_v16 = vmul.f32 0.6931472, %v163_v15 }
 0x13d   :  { %v90_v18 = vadd.f32 %v89_v16, %v81_v4 }
 0x13f   :  { %v110_v19 = vsub.f32 %v90_v18, %v98_v17 }
 0x141   :  { %v111_v20 = vsel %vm109_vm4, %v110_v19, 0.0 }
 0x142   :  { %v114_v21 = vsel %vm113_vm5, %v111_v20, 0.0 }
 0x143   :  { %115 = vadd.xlane.f32.xlu1 %v114_v21 }
 0x1d0   :  { %v116_v23 = vpop.xlane.xlu1 %115 }
 0x1d1   :  { %v117_v24 = vrot.slane %v116_v23, 4 }
 0x1d3   :  { %v118_v25 = vadd.f32 %v117_v24, %v116_v23 }
 0x1d5   :  { %v119_v26 = vrot.slane %v118_v25, 2 }
 0x1d7   :  { %v120_v27 = vadd.f32 %v119_v26, %v118_v25 }
 0x1d9   :  { %v121_v28 = vrot.slane %v120_v27, 1 }
 0x1db   :  { %v122_v29 = vadd.f32 %v121_v28, %v120_v27 }
 0x1dd   :  { %154 = vpush %v122_v29 }
 0x20e   :  { %s155_s13 = spop %154 }
 0x20f   :  { %v124_v31 = vstv %s155_s13 }
 0x210   :  { %v125_v32 = vadd.f32 %v124_v31, %v112_v30 }
 0x212   :  { %127 = vst.msk [vmem:[#allocation2] sm:$0x1] %vm72_vm6, %v125_v32 }
 0x213   :  { %175 = shalt.err (!%p172_p4)
}
 0x214   :  { %s176_s18 = scalar_lea.hbm %s231_s2, 16 }
 0x215   :  { %p177_p5 = scmp.ne.s32.totalorder %s231_s2, %s176_s18  ;;  %p180_p6 = scmp.lt.u32.totalorder %s176_s18, %s231_s2 }
 0x217   :  { %p182_p7 = pnand %p180_p6, %p177_p5 }
 0x219   :  { %185 = shalt.err (!%p182_p7)
}
 0x21a   :  { %137 = dma.vmem_to_hbm [thread:$0]  %s135_s1, 16, %s231_s2, [#allocation3]  }
 0x21b   :  { %186 = dma.done.wait [#allocation3], 16  }
 0x21c   :  { %187 = vsyncadd [#allocation3], 4294967280 }
 0x21d   :  { %141 = vsyncpa [#allocation3], 1 }

</bundles_post_ra>
